<compile_context>
chip_gen: v7x
topology: tpu7x:2x2x1
jax: 0.10.0
libtpu: 0.0.40
codegen_flags: <defaults>
</compile_context>

<pallas_src>
import jax
import jax.numpy as jnp
from jax.experimental import pallas as pl
from jax.experimental.pallas import tpu as pltpu


def _mlp_softmax_kernel(x_ref, w1_ref, b1_ref, w23_ref, b23_ref, o_ref):
    # Linear 1 (bf16 x bf16 -> f32 accumulate) + bias + ReLU
    h1 = jnp.dot(x_ref[...], w1_ref[...],
                 preferred_element_type=jnp.float32) + b1_ref[...]
    h1 = jnp.maximum(h1, 0.0)

    # Fused Linear2+Linear3 head (padded to 128 lanes; pad-lane bias = -1e30)
    logits = jnp.dot(h1.astype(jnp.bfloat16), w23_ref[...],
                     preferred_element_type=jnp.float32) + b23_ref[...]

    # Numerically-stable softmax along the last axis (padded lanes -> exp == 0)
    m = jnp.max(logits, axis=-1, keepdims=True)
    e = jnp.exp(logits - m)
    denom = jnp.sum(e, axis=-1, keepdims=True)
    o_ref[...] = (e * pl.reciprocal(denom, approx=True)).astype(o_ref.dtype)


def reinforcement_model_forward(x, params, *, block_batch=512):
    """x: (batch, input_dim) float32. params: dict with (in,out) weights, (1,out) biases."""
    batch, input_dim = x.shape
    hidden = params["w1"].shape[1]
    out_dim = params["w3"].shape[1]

    # --- wrapper-side (once per call) algebraic fusion of Linear2/Linear3 ---
    w23 = params["w2"] @ params["w3"]                       # (hidden, out_dim)
    b23 = params["b2"] @ params["w3"] + params["b3"]        # (1, out_dim)

    # --- lane-dense output head: pad to a multiple of 128 lanes ---
    out_pad = max(128, ((out_dim + 127) // 128) * 128)
    w23_p = jnp.zeros((hidden, out_pad), jnp.float32).at[:, :out_dim].set(w23)
    b23_p = jnp.full((1, out_pad), -1e30, jnp.float32).at[:, :out_dim].set(b23)

    # --- batch tiling (sublane-aligned), pad batch to a whole number of tiles ---
    tb = min(block_batch, max(8, ((batch + 7) // 8) * 8))
    tb = ((tb + 7) // 8) * 8
    pb = ((batch + tb - 1) // tb) * tb
    if pb != batch:
        x = jnp.pad(x, ((0, pb - batch), (0, 0)))

    # --- bf16 matmul inputs, f32 accumulation inside the kernel ---
    x_bf = x.astype(jnp.bfloat16)
    w1_bf = params["w1"].astype(jnp.bfloat16)
    w23_bf = w23_p.astype(jnp.bfloat16)
    b1 = params["b1"].astype(jnp.float32)

    grid = (pb // tb,)
    out = pl.pallas_call(
        _mlp_softmax_kernel,
        out_shape=jax.ShapeDtypeStruct((pb, out_pad), jnp.float32),
        grid=grid,
        in_specs=[
            pl.BlockSpec((tb, input_dim), lambda i: (i, 0)),      # x tile (pipelined)
            pl.BlockSpec((input_dim, hidden), lambda i: (0, 0)),  # w1 (resident)
            pl.BlockSpec((1, hidden), lambda i: (0, 0)),          # b1 (resident)
            pl.BlockSpec((hidden, out_pad), lambda i: (0, 0)),    # fused W23 (resident)
            pl.BlockSpec((1, out_pad), lambda i: (0, 0)),         # fused b23 (resident)
        ],
        out_specs=pl.BlockSpec((tb, out_pad), lambda i: (i, 0)),  # lane-dense output
        compiler_params=pltpu.CompilerParams(
            dimension_semantics=("parallel",),
        ),
    )(x_bf, w1_bf, b1, w23_bf, b23_p)

    return out[:batch, :out_dim]


def init_params(key, input_dim, output_dim, hidden=64):
    """Deterministic PyTorch-style uniform init (U(-1/sqrt(fan_in), 1/sqrt(fan_in)))."""
    def linear_init(k, fan_in, fan_out):
        kw, kb = jax.random.split(k)
        bound = 1.0 / jnp.sqrt(jnp.float32(fan_in))
        w = jax.random.uniform(kw, (fan_in, fan_out), jnp.float32, -bound, bound)
        b = jax.random.uniform(kb, (1, fan_out), jnp.float32, -bound, bound)
        return w, b

    k1, k2, k3 = jax.random.split(key, 3)
    w1, b1 = linear_init(k1, input_dim, hidden)
    w2, b2 = linear_init(k2, hidden, hidden)
    w3, b3 = linear_init(k3, hidden, output_dim)
    return {"w1": w1, "b1": b1, "w2": w2, "b2": b2, "w3": w3, "b3": b3}


def _reference_forward(x, p):
    # Pure-JAX f32 reference matching the PyTorch module exactly (un-fused).
    h1 = jnp.maximum(x @ p["w1"] + p["b1"], 0.0)
    h2 = h1 @ p["w2"] + p["b2"]
    logits = h2 @ p["w3"] + p["b3"]
    return jax.nn.softmax(logits, axis=1)


if __name__ == "__main__":
    key = jax.random.PRNGKey(0)
    k_x, k_p = jax.random.split(key)

    batch, input_dim, output_dim = 24, 32, 8
    x = jax.random.normal(k_x, (batch, input_dim), jnp.float32)
    params = init_params(k_p, input_dim, output_dim)

    # Small block_batch in the demo just to exercise a multi-tile grid (grid=(3,));
    # production callers should leave the default (>=512 rows per tile).
    out = reinforcement_model_forward(x, params, block_batch=8)
    out = jax.block_until_ready(out)

    ref = _reference_forward(x, params)
    assert out.shape == (batch, output_dim)
    # bf16 matmul inputs + approx reciprocal -> compare with a bf16-level tolerance.
    assert jnp.allclose(out, ref, atol=3e-2, rtol=3e-2), float(jnp.max(jnp.abs(out - ref)))
    # rows sum to 1 (softmax; padded lanes contribute exactly 0)
    assert jnp.allclose(jnp.sum(out, axis=1), jnp.ones((batch,)), atol=1e-2)

    print("KERNEL_OK")
</pallas_src>

<mosaic_0001>
module attributes {stable_mosaic.version = 11 : i64} {
  func.func @_mlp_softmax_kernel(%arg0: i32, %arg1: memref<8x32xbf16, #tpu.memory_space<vmem>>, %arg2: memref<32x64xbf16, #tpu.memory_space<vmem>>, %arg3: memref<1x64xf32, #tpu.memory_space<vmem>>, %arg4: memref<64x128xbf16, #tpu.memory_space<vmem>>, %arg5: memref<1x128xf32, #tpu.memory_space<vmem>>, %arg6: memref<8x128xf32, #tpu.memory_space<vmem>>) attributes {dimension_semantics = [#tpu.dimension_semantics<parallel>], iteration_bounds = array<i64: 3>, scalar_prefetch = 0 : i64, scratch_operands = 0 : i64, tpu.core_type = #tpu.core_type<tc>, window_params = [{transform_indices = @transform_0, window_bounds = array<i64: 8, 32>}, {pipeline_mode = #tpu.pipeline_mode<synchronous>, transform_indices = @transform_1, window_bounds = array<i64: 32, 64>}, {pipeline_mode = #tpu.pipeline_mode<synchronous>, transform_indices = @transform_2, window_bounds = array<i64: 1, 64>}, {pipeline_mode = #tpu.pipeline_mode<synchronous>, transform_indices = @transform_3, window_bounds = array<i64: 64, 128>}, {pipeline_mode = #tpu.pipeline_mode<synchronous>, transform_indices = @transform_4, window_bounds = array<i64: 1, 128>}, {transform_indices = @transform_5, window_bounds = array<i64: 8, 128>}]} {
    %c0 = arith.constant 0 : index
    %c0_0 = arith.constant 0 : index
    %0 = vector.load %arg1[%c0, %c0_0] : memref<8x32xbf16, #tpu.memory_space<vmem>>, vector<8x32xbf16>
    %c0_1 = arith.constant 0 : index
    %c0_2 = arith.constant 0 : index
    %1 = vector.load %arg2[%c0_1, %c0_2] : memref<32x64xbf16, #tpu.memory_space<vmem>>, vector<32x64xbf16>
    %cst = arith.constant dense<0.000000e+00> : vector<8x64xf32>
    %2 = tpu.matmul %0, %1, %cst {dimension_numbers = #tpu.dot_dimension_numbers<[1], [0], [0], [1], [0, 0, 1, 1], [], []>} : vector<8x32xbf16>, vector<32x64xbf16>, vector<8x64xf32> -> vector<8x64xf32>
    %c0_3 = arith.constant 0 : index
    %c0_4 = arith.constant 0 : index
    %3 = vector.load %arg3[%c0_3, %c0_4] : memref<1x64xf32, #tpu.memory_space<vmem>>, vector<1x64xf32>
    %4 = vector.broadcast %3 : vector<1x64xf32> to vector<8x64xf32>
    %5 = arith.addf %2, %4 : vector<8x64xf32>
    %cst_5 = arith.constant 0.000000e+00 : f32
    %6 = vector.broadcast %cst_5 : f32 to vector<8x64xf32>
    %7 = arith.maximumf %5, %6 : vector<8x64xf32>
    %8 = arith.truncf %7 : vector<8x64xf32> to vector<8x64xbf16>
    %c0_6 = arith.constant 0 : index
    %c0_7 = arith.constant 0 : index
    %9 = vector.load %arg4[%c0_6, %c0_7] : memref<64x128xbf16, #tpu.memory_space<vmem>>, vector<64x128xbf16>
    %cst_8 = arith.constant dense<0.000000e+00> : vector<8x128xf32>
    %10 = tpu.matmul %8, %9, %cst_8 {dimension_numbers = #tpu.dot_dimension_numbers<[1], [0], [0], [1], [0, 0, 1, 1], [], []>} : vector<8x64xbf16>, vector<64x128xbf16>, vector<8x128xf32> -> vector<8x128xf32>
    %c0_9 = arith.constant 0 : index
    %c0_10 = arith.constant 0 : index
    %11 = vector.load %arg5[%c0_9, %c0_10] : memref<1x128xf32, #tpu.memory_space<vmem>>, vector<1x128xf32>
    %12 = vector.broadcast %11 : vector<1x128xf32> to vector<8x128xf32>
    %13 = arith.addf %10, %12 : vector<8x128xf32>
    %cst_11 = arith.constant dense<0xFF800000> : vector<8xf32>
    %14 = vector.multi_reduction <maximumf>, %13, %cst_11 [1] : vector<8x128xf32> to vector<8xf32>
    %15 = vector.shape_cast %14 : vector<8xf32> to vector<8x1xf32>
    %16 = vector.broadcast %15 : vector<8x1xf32> to vector<8x128xf32>
    %17 = arith.subf %13, %16 : vector<8x128xf32>
    %18 = math.exp %17 : vector<8x128xf32>
    %cst_12 = arith.constant dense<0.000000e+00> : vector<8xf32>
    %19 = vector.multi_reduction <add>, %18, %cst_12 [1] : vector<8x128xf32> to vector<8xf32>
    %20 = vector.shape_cast %19 : vector<8xf32> to vector<8x1xf32>
    %21 = tpu.reciprocal %20 {approx = true} : vector<8x1xf32> -> vector<8x1xf32>
    %22 = vector.broadcast %21 : vector<8x1xf32> to vector<8x128xf32>
    %23 = arith.mulf %18, %22 : vector<8x128xf32>
    %c0_13 = arith.constant 0 : index
    %c0_14 = arith.constant 0 : index
    %24 = vector.load %arg6[%c0_13, %c0_14] : memref<8x128xf32, #tpu.memory_space<vmem>>, vector<8x128xf32>
    tpu.vector_store %arg6[%c0_13, %c0_14], %23 {strides = array<i32>} : memref<8x128xf32, #tpu.memory_space<vmem>>, vector<8x128xf32>,
    return
  }
  func.func @transform_0(%arg0: i32) -> (i32, i32) {
    %c0_i32 = arith.constant 0 : i32
    %c0_i32_0 = arith.constant 0 : i32
    return %arg0, %c0_i32 : i32, i32
  }
  func.func @transform_1(%arg0: i32) -> (i32, i32) {
    %c0_i32 = arith.constant 0 : i32
    %c0_i32_0 = arith.constant 0 : i32
    %c0_i32_1 = arith.constant 0 : i32
    return %c0_i32, %c0_i32_0 : i32, i32
  }
  func.func @transform_2(%arg0: i32) -> (i32, i32) {
    %c0_i32 = arith.constant 0 : i32
    %c0_i32_0 = arith.constant 0 : i32
    %c0_i32_1 = arith.constant 0 : i32
    return %c0_i32, %c0_i32_0 : i32, i32
  }
  func.func @transform_3(%arg0: i32) -> (i32, i32) {
    %c0_i32 = arith.constant 0 : i32
    %c0_i32_0 = arith.constant 0 : i32
    %c0_i32_1 = arith.constant 0 : i32
    return %c0_i32, %c0_i32_0 : i32, i32
  }
  func.func @transform_4(%arg0: i32) -> (i32, i32) {
    %c0_i32 = arith.constant 0 : i32
    %c0_i32_0 = arith.constant 0 : i32
    %c0_i32_1 = arith.constant 0 : i32
    return %c0_i32, %c0_i32_0 : i32, i32
  }
  func.func @transform_5(%arg0: i32) -> (i32, i32) {
    %c0_i32 = arith.constant 0 : i32
    %c0_i32_0 = arith.constant 0 : i32
    return %arg0, %c0_i32 : i32, i32
  }
}

</mosaic_0001>

<bundles_post_ra>
// kernel: tpu_custom_call.1
= control target key start
LH: loop header
LB: loop body
LE: loop exit
PB: predicated region body
PF: predicated region fallthrough
CT: control target
= control target key end

     0   :  { %10 = vsyncpa [#allocation3], 0  ;;  %s1094_s0 = inlined_call_operand.hbm [shape: bf16[24,32], index: 0, kind: input, shape index: {}]   ;;  %s1095_s1 = inlined_call_operand.hbm [shape: bf16[32,64], index: 1, kind: input, shape index: {}]   ;;  %s1096_s2 = inlined_call_operand.vmem [shape: f32[1,64], index: 2, kind: input, shape index: {}]   ;;  %s1097_s3 = inlined_call_operand.hbm [shape: bf16[64,128], index: 3, kind: input, shape index: {}]   ;;  %s1098_s4 = inlined_call_operand.vmem [shape: f32[1,128], index: 4, kind: input, shape index: {}]   ;;  %s1099_s5 = inlined_call_operand.hbm [shape: f32[24,128], index: 5, kind: output, shape index: {}]  }
   0x1   :  { %12 = vsyncpa [#allocation3 + $0x1], 0 }
   0x2   :  { %13 = vsyncpa [#allocation6], 0 }
   0x3   :  { %14 = vsyncpa [#allocation4], 0 }
   0x4   :  { %16 = vsyncpa [#allocation4 + $0x1], 0  ;;  %s867_s18 = smov 0   ;;  %s869_s19 = smov 0  }
   0x5   :  { %s871_s20 = smov 0   ;;  %s873_s21 = smov 0  }
   0x6 LB: > { %s888_s22 = sadd.s32 4294967295, %s827_s21   ;;  %s536_s23 = sadd.s32 4294967294, %s827_s21   ;;  %s827_s21 = sphi %s873_s21, %s1118_s21   ;;  %s823_s20 = sphi %s871_s20, %s1117_s20   ;;  %s819_s19 = sphi %s869_s19, %s1116_s19   ;;  %s815_s18 = sphi %s867_s18, %s1115_s18  }
   0x7   : > { %p42_p0 = scmp.ne.s32.totalorder %s819_s19, %s815_s18  ;;  %p1100_p1 = scmp.eq.s32.totalorder %s888_s22, 0 }
   0x8   : > { %p156_p3 = scmp.eq.s32.totalorder %s536_s23, 2  ;;  %p537_p5 = scmp.ge.s32.totalorder %s827_s21, 1 }
   0x9   : > { %p897_p4 = por %p1100_p1, %p42_p0  ;;  %p163_p7 = scmp.lt.s32.totalorder %s827_s21, 4 }
   0xa   : > { %p902_p6 = por %p156_p3, %p42_p0  ;;  %s829_s27 = smov [#allocation5]  }
   0xb   : > { %s1103_s24 = scalar_select %p897_p4, 1, 0 }
   0xc   : > { %s1104_s25 = scalar_select %p902_p6, 1, 0 }
   0xd   : > { %p907_p8 = pnand %p537_p5, %p163_p7  ;;  %s175_s28 = sshll.u32 %s829_s27, 4  ;;  %s176_s28 = int_to_ptr.vmem [resolvable:$true] %s175_s28 }
   0xe   : > { %s830_s30 = smov [#allocation7]   ;;  %s671_s9 = scalar_lea.hbm %s1095_s1, 256 }
   0xf   : > { %s1105_s26 = scalar_select %p907_p8, 1, 0 }
  0x10   : > { %p602_p9 = pneg %p907_p8  ;;  %s191_s6 = sshll.u32 %s830_s30, 4  ;;  %s919_s6 = int_to_ptr.vmem [resolvable:$true] %s191_s6 }
  0x11   : > { %p672_p11 = scmp.ne.s32.totalorder %s1095_s1, %s671_s9  ;;  %p678_p3 = scmp.lt.u32.totalorder %s671_s9, %s1095_s1 }
  0x12   : > { %p915_p10 = pnand %p602_p9, %p1100_p1 }
  0x14   : > { %p673_p12 = pneg %p915_p10 }
  0x16   : > { %p674_p13 = pnand %p673_p12, %p672_p11 }
  0x18   : > { %p675_p0 = pneg %p674_p13 }
  0x1a   : > { %p680_p5 = pnand %p678_p3, %p675_p0 }
  0x1c   : > { %683 = shalt.err (!%p680_p5)
}
  0x1d   : > { %s684_s14 = scalar_lea.vmem %s176_s28, 256  ;;  %p692_p2 = scmp.lt.s32.totalorder %s176_s28, %s176_s28 }
  0x1e   : > { %p685_p7 = scmp.ne.s32.totalorder %s176_s28, %s684_s14  ;;  %p693_p6 = scmp.lt.s32.totalorder %s684_s14, %s684_s14 }
  0x20   : > { %p687_p9 = pnand %p685_p7, %p673_p12  ;;  %p694_p4 = por %p693_p6, %p692_p2 }
  0x22   : > { %p688_p1 = pneg %p687_p9 }
  0x24   : > { %p695_p8 = pnand %p694_p4, %p688_p1 }
  0x26   : > { %698 = shalt.err (!%p695_p8)
}
  0x27   : > { %s831_s15 = smov 64   ;;  %s832_s16 = smov 4  }
  0x28   : > { %605 = dma.hbm_to_vmem [thread:$0]  (!%p915_p10), %s1095_s1, 256, %s176_s28, [#allocation6], %s831_s15, %s831_s15, %s832_s16  }
  0x29   : > { %s699_s7 = scalar_lea.hbm %s1097_s3, 512 }
  0x2a   : > { %p700_p11 = scmp.ne.s32.totalorder %s1097_s3, %s699_s7  ;;  %p706_p4 = scmp.lt.u32.totalorder %s699_s7, %s1097_s3 }
  0x2c   : > { %p702_p1 = pnand %p700_p11, %p673_p12 }
  0x2e   : > { %p703_p2 = pneg %p702_p1 }
  0x30   : > { %p708_p6 = pnand %p706_p4, %p703_p2 }
  0x32   : > { %711 = shalt.err (!%p708_p6)
}
  0x33   : > { %s712_s28 = scalar_lea.vmem %s919_s6, 512  ;;  %p720_p3 = scmp.lt.s32.totalorder %s919_s6, %s919_s6 }
  0x34   : > { %p713_p8 = scmp.ne.s32.totalorder %s919_s6, %s712_s28  ;;  %p721_p5 = scmp.lt.s32.totalorder %s712_s28, %s712_s28 }
  0x36   : > { %p715_p13 = pnand %p713_p8, %p673_p12  ;;  %p722_p7 = por %p721_p5, %p720_p3 }
  0x38   : > { %p716_p0 = pneg %p715_p13 }
  0x3a   : > { %p723_p9 = pnand %p722_p7, %p716_p0 }
  0x3c   : > { %726 = shalt.err (!%p723_p9)
}
  0x3d   : > { %608 = dma.hbm_to_vmem [thread:$0]  (!%p915_p10), %s1097_s3, 512, %s919_s6, [#allocation6], %s831_s15, %s831_s15, %s832_s16  }
  0x3e   : > { %s969_s14 = sadd.s32 1, %s827_s21   ;;  %s29_s29 = sadd.s32 1, %s823_s20 }
  0x3f   : > { %s26_s17 = ssub.s32 %s827_s21, %s969_s14  ;;  %p36_p12 = scmp.ne.s32.totalorder %s823_s20, %s819_s19 }
  0x40   : > { %p27_p11 = scmp.eq.s32.totalorder %s26_s17, 0  ;;  %p37_p1 = scmp.eq.s32.totalorder %s827_s21, 0 }
  0x41   : > { %p1107_p2 = scmp.eq.s32.totalorder %s888_s22, 2  ;;  %p619_p6 = scmp.lt.s32.totalorder %s827_s21, 3 }
  0x42   : > { %s985_s27 = scalar_select %p27_p11, %s823_s20, %s29_s29  }
  0x43   : > { %p979_p4 = por %p1107_p2, %p36_p12  ;;  %p38_p8 = por %p37_p1, %p36_p12 }
  0x44   : > { %s208_s30 = sand.u32 1, %s823_s20   ;;  %s542_s6 = sshll.u32 %s827_s21, 6 }
  0x45   : > { %s541_s7 = sshll.u32 %s208_s30, 2  ;;  %s992_s8 = scalar_lea.hbm %s1094_s0, %s542_s6 }
  0x46   : > { %s212_s9 = scalar_lea.vmem [#allocation2], %s541_s7  ;;  %p996_p10 = pnand %p619_p6, %p38_p8 }
  0x47   : > { %s219_s10 = sshll.u32 %s212_s9, 4  ;;  %s209_s28 = scalar_lea.sflag [#allocation3], %s208_s30  ;;  %s994_s10 = int_to_ptr.vmem [resolvable:$true] %s219_s10 }
  0x48   : > { %s727_s12 = scalar_lea.hbm %s992_s8, 64  ;;  %p729_p0 = pneg %p996_p10 }
  0x49   : > { %p728_p13 = scmp.ne.s32.totalorder %s992_s8, %s727_s12  ;;  %s732_s17 = scalar_lea.hbm %s1094_s0, 192 }
  0x4a   : > { %p733_p7 = scmp.lt.u32.totalorder %s992_s8, %s1094_s0  ;;  %p734_p9 = scmp.lt.u32.totalorder %s732_s17, %s727_s12 }
  0x4b   : > { %p730_p3 = pnand %p729_p0, %p728_p13  ;;  %p736_p11 = scmp.lt.u32.totalorder %s727_s12, %s992_s8 }
  0x4c   : > { %p735_p12 = por %p734_p9, %p733_p7 }
  0x4d   : > { %p731_p5 = pneg %p730_p3 }
  0x4e   : > { %p737_p1 = por %p736_p11, %p735_p12 }
  0x50   : > { %p738_p2 = pnand %p737_p1, %p731_p5 }
  0x52   : > { %741 = shalt.err (!%p738_p2)
}
  0x53   : > { %s742_s30 = scalar_lea.vmem %s994_s10, 64  ;;  %s833_s15 = smov [#allocation2]  }
  0x54   : > { %p743_p6 = scmp.ne.s32.totalorder %s994_s10, %s742_s30  ;;  %s747_s16 = sshll.u32 %s833_s15, 4  ;;  %s748_s16 = int_to_ptr.vmem [resolvable:$false] %s747_s16 }
  0x55   : > { %s749_s9 = scalar_lea.vmem %s748_s16, 128  ;;  %p750_p3 = scmp.lt.s32.totalorder %s994_s10, %s748_s16 }
  0x56   : > { %p745_p8 = pnand %p743_p6, %p729_p0  ;;  %p751_p7 = scmp.lt.s32.totalorder %s749_s9, %s742_s30 }
  0x58   : > { %p746_p13 = pneg %p745_p8  ;;  %p752_p9 = por %p751_p7, %p750_p3 }
  0x5a   : > { %p753_p12 = pnand %p752_p9, %p746_p13 }
  0x5c   : > { %756 = shalt.err (!%p753_p12)
}
  0x5d   : > { %612 = dma.hbm_to_vmem [thread:$0]  (!%p996_p10), %s992_s8, 64, %s994_s10, %s209_s28  }
  0x5e   : > { %p1110_p5 = scmp.ne.s32.totalorder %s1105_s26, 0 }
  0x5f   : > { %s1028_s12 = sand.u32 (!%p1110_p5), 1, %s819_s19   ;;  %p1111_p0 = scmp.ne.s32.totalorder (!%p1110_p5), %s1103_s24, 0 }
  0x60   : > { %228 = sbr.rel (%p1110_p5) target bundleno = 875 (0x36b), region = 40  ;;  %s544_s13 = sshll.u32 (!%p1110_p5), %s1028_s12, 2 }
  0x61   : > { %s231_s29 = scalar_lea.sflag (!%p1110_p5), [#allocation3], %s1028_s12  ;;  %s234_s17 = scalar_lea.vmem (!%p1110_p5), [#allocation2], %s544_s13 }
  0x67   : > { %802 = dma.done.wait (%p1111_p0), %s231_s29, 64  }
  0x68   : > { %804 = vsyncadd (%p1111_p0), %s231_s29, 4294967232  ;;  %p1112_p11 = scmp.eq.s32.totalorder %s888_s22, 0 }
  0x6a   : > { %806 = dma.done.wait (%p1112_p11), [#allocation6], 768   ;;  %p1113_p10 = pmov %p1112_p11 }
  0x6b   : > { %v834_v0 = vmov 0.0   ;;  %vm835_vm0 = vmmov 0   ;;  %v661_v1 = vld [vmem:[#allocation5] sm:$0xff]   ;;  %v662_v2 = vld [vmem:[#allocation5 + $0x8] sm:$0xff]   ;;  %v663_v3 = vld [vmem:[#allocation7] sm:$0xff]   ;;  %vm294_vm1 = vcmask 261120  }
  0x6c   : > { %808 = vsyncadd (%p1113_p10), [#allocation6], 4294966528  ;;  %570 = vmatprep.subr.bf16.mxu0 %v834_v0  ;;  %574 = vmatprep.mubr.msk.bf16.mxu0 %vm835_vm0, %v834_v0  ;;  %v664_v4 = vld [vmem:[#allocation7 + $0x8] sm:$0xff]   ;;  %v665_v6 = vld [vmem:[#allocation7 + $0x10] sm:$0xff]   ;;  %vm379_vm2 = vcmask 523264   ;;  %s547_s11 = sshll.u32 %s1028_s12, 3 }
  0x6d   : > { %578 = vmatprep.subr.bf16.mxu1 %v834_v0  ;;  %586 = vmatprep.mubr.msk.bf16.mxu1 %vm835_vm0, %v834_v0  ;;  %v270_v5 = vld [vmem:[%s234_s17] sm:$0xf]  ;;  %v666_v7 = vld [vmem:[#allocation7 + $0x18] sm:$0xff]   ;;  %s559_s28 = sshll.u32 %s888_s22, 7  ;;  %s268_s7 = scalar_lea.vmem [#allocation8], %s547_s11 }
  0x6e   : > { %571 = vmatpush3.bf16.msra.mxu0 %v661_v1  ;;  %579 = vmatpush3.bf16.msra.mxu1 %v663_v3  ;;  %v548_v8 = vld [vmem:[%s1096_s2] ss:$0 sm:$0xff]  ;;  %s447_s6 = sshll.u32 %s268_s7, 4  ;;  %s1051_s16 = scalar_lea.hbm %s1099_s5, %s559_s28  ;;  %s1053_s6 = int_to_ptr.vmem [resolvable:$true] %s447_s6 }
  0x6f   : > { %572 = vmatprep.subr.bf16.mxu0 %v834_v0  ;;  %580 = vmatprep.subr.bf16.mxu1 %v834_v0  ;;  %v552_v16 = vld [vmem:[%s1098_s4] ss:$0 sm:$0xff]  ;;  %s434_s9 = scalar_lea.sflag [#allocation4], %s1028_s12  ;;  %s757_s13 = scalar_lea.vmem %s1053_s6, 128 }
  0x70   : > { %p758_p1 = scmp.ne.s32.totalorder %s1053_s6, %s757_s13  ;;  %s836_s22 = smov [#allocation8]  }
  0x71   : > { %s761_s29 = sshll.u32 %s836_s22, 4  ;;  %s762_s29 = int_to_ptr.vmem [resolvable:$false] %s761_s29 }
  0x72   : > { %573 = vmatpush3.bf16.msra.mxu0 %v662_v2  ;;  %581 = vmatpush3.bf16.msra.mxu1 %v664_v4  ;;  %p759_p2 = pnand %p758_p1, %p979_p4  ;;  %s763_s17 = scalar_lea.vmem %s762_s29, 256 }
  0x73   : > { %582 = vmatprep.subr.bf16.mxu1 %v834_v0  ;;  %p764_p8 = scmp.lt.s32.totalorder %s1053_s6, %s762_s29  ;;  %p765_p13 = scmp.lt.s32.totalorder %s763_s17, %s757_s13 }
  0x74   : > { %p760_p6 = pneg %p759_p2 }
  0x75   : > { %575 = vmatmul.mubr.msk.bf16.vlgmr.msra.gmra.mrb[0].mxu0 %vm294_vm1, %v270_v5  ;;  %p766_p3 = por %p765_p13, %p764_p8 }
  0x76   : > { %583 = vmatpush3.bf16.msra.mxu1 %v665_v6 }
  0x77   : > { %584 = vmatprep.subr.bf16.mxu1 %v834_v0  ;;  %p767_p7 = pnand %p766_p3, %p760_p6 }
  0x7a   : > { %585 = vmatpush3.bf16.msra.mxu1 %v666_v7 }
 0x148   : > { %v332_v9 = vpop.f32.mrb[0].mxu0 }
 0x149   : > { %v333_v10 = vadd.f32 %v548_v8, %v332_v9  ;;  %v576_v11 = vpop.f32.mrb[1].mxu0 }
 0x14a   : > { %v335_v12 = vpop.f32.mrb[2].mxu0 }
 0x14b   : > { %v338_v13 = vmax.f32 %v333_v10, 0.0  ;;  %v577_v14 = vpop.f32.mrb[3].mxu0 }
 0x14d   : > { %v339_v15 = vpack.c.bf16 %v338_v13, %v338_v13 }
 0x14f   : > { %587 = vmatmul.mubr.msk.bf16.vlgmr.msra.gmra.mrb[0].mxu1 %vm379_vm2, %v339_v15 }
 0x222   : > { %v417_v17 = vpop.f32.mrb[0].mxu1 }
 0x223   : > { %v418_v18 = vadd.f32 %v552_v16, %v417_v17  ;;  %v588_v19 = vpop.f32.mrb[1].mxu1 }
 0x224   : > { %v420_v20 = vpop.f32.mrb[2].mxu1 }
 0x225   : > { %423 = vmax.xlane.f32.xlu0 %v418_v18  ;;  %v589_v21 = vpop.f32.mrb[3].mxu1 }
 0x2b2   : > { %v424_v22 = vpop.xlane.xlu0 %423 }
 0x2b3   : > { %v425_v23 = vsub.f32 %v418_v18, %v424_v22 }
 0x2b5   : > { %v426_v24 = vmul.f32 1.442695, %v425_v23 }
 0x2b7   : > { %667 = vpow2.f32 %v426_v24 }
 0x2c1   : > { %v668_v25 = vpop.eup %667 }
 0x2c2   : > { %428 = vadd.xlane.f32.xlu0 %v668_v25 }
 0x34f   : > { %v429_v26 = vpop.xlane.xlu0 %428 }
 0x350   : > { %669 = vrcp.f32 %v429_v26 }
 0x35a   : > { %v670_v27 = vpop.eup %669 }
 0x35b   : > { %v431_v28 = vmul.f32 %v670_v27, %v668_v25 }
 0x35d   : > { %432 = vst [vmem:[%s268_s7] sm:$0xff] %v431_v28 }
 0x35e   : > { %770 = shalt.err (!%p767_p7)
}
 0x35f   : > { %s771_s12 = scalar_lea.hbm %s1051_s16, 128  ;;  %s775_s8 = scalar_lea.hbm %s1099_s5, 384 }
 0x360   : > { %p772_p9 = scmp.ne.s32.totalorder %s1051_s16, %s771_s12  ;;  %p776_p0 = scmp.lt.u32.totalorder %s1051_s16, %s1099_s5 }
 0x361   : > { %p777_p11 = scmp.lt.u32.totalorder %s775_s8, %s771_s12  ;;  %p779_p1 = scmp.lt.u32.totalorder %s771_s12, %s1051_s16 }
 0x362   : > { %p773_p12 = pnand %p772_p9, %p979_p4 }
 0x363   : > { %p778_p10 = por %p777_p11, %p776_p0 }
 0x364   : > { %p774_p5 = pneg %p773_p12 }
 0x365   : > { %p780_p2 = por %p779_p1, %p778_p10 }
 0x367   : > { %p781_p6 = pnand %p780_p2, %p774_p5 }
 0x369   : > { %784 = shalt.err (!%p781_p6)
}
 0x36a   : > { %600 = dma.vmem_to_hbm [thread:$0]  (%p979_p4), %s1053_s6, 128, %s1051_s16, %s434_s9  }
 0x36b PF: > { %p622_p8 = scmp.ge.s32.totalorder %s827_s21, 2  ;;  %s459_s28 = sand.u32 1, %s815_s18  }
 0x36c   : > { %p1114_p13 = scmp.ne.s32.totalorder %s1104_s25, 0  ;;  %s460_s7 = scalar_lea.sflag [#allocation4], %s459_s28 }
 0x36e   : > { %p614_p3 = pnand %p622_p8, %p1114_p13 }
 0x370   : > { %810 = dma.done.wait (!%p614_p3), %s460_s7, 128  }
 0x371   : > { %812 = vsyncadd (!%p614_p3), %s460_s7, 4294967168  ;;  %p19_p7 = scmp.ge.s32.totalorder %s969_s14, 5   ;;  %s1115_s18 = smov %s819_s19 }
 0x372   : > { %s1116_s19 = smov %s823_s20  ;;  %s1117_s20 = smov %s985_s27 }
 0x373   : > { %s1118_s21 = smov %s969_s14  ;;  %21 = sbr.rel (!%p19_p7) target bundleno = 6 (0x6), region = 93 }
 0x37a   :  { %465 = vsyncpa [#allocation3], 1 }
 0x37b   :  { %467 = vsyncpa [#allocation3 + $0x1], 1 }
 0x37c   :  { %468 = vsyncpa [#allocation6], 1 }
 0x37d   :  { %469 = vsyncpa [#allocation4], 1 }
 0x37e   :  { %471 = vsyncpa [#allocation4 + $0x1], 1 }

</bundles_post_ra>
